<compile_context>
chip_gen: v6e
topology: v6e:2x2x1
jax: 0.10.0
libtpu: 0.0.40
codegen_flags: <defaults>
</compile_context>

<pallas_src>
import functools

import jax
import jax.numpy as jnp
from jax.experimental import pallas as pl
from jax.experimental.pallas import tpu as pltpu


NEG_SLOPE = 0.3  # nn.LeakyReLU(0.3)

_LANE = 128
_ACT_VMEM_BUDGET = 24 * 1024 * 1024   # activation-path budget (all TPU gens)
_MAX_TILE_B = 64 * 1024               # cap on lane-dense batch tile
_VMEM_LIMIT_CAP = 48 * 1024 * 1024    # stays inside v7x's 64 MiB/TC VMEM
_MIN_COLS_PER_CORE = 8192             # only split into >=2 tiles past this


def _round_up(a: int, m: int) -> int:
    return ((a + m - 1) // m) * m


def _cdiv(a: int, b: int) -> int:
    return (a + b - 1) // b


def _mlp_kernel(num_linear, neg_slope, *refs):
    """refs = (x_ref, w0_ref, b0_ref, w1_ref, b1_ref, ..., out_ref).

    x_ref:   (in_dim, TB)    activations, batch on the lane axis
    wI_ref:  (out_I, in_I)   PyTorch weight layout
    bI_ref:  (out_I, 1)      bias, broadcast over lanes
    out_ref: (out_dim, TB)
    """
    x_ref = refs[0]
    out_ref = refs[-1]

    h = x_ref[...]
    for li in range(num_linear):
        w = refs[1 + 2 * li][...]                      # (out, in)
        b = refs[2 + 2 * li][...].astype(jnp.float32)  # (out, 1)
        # Feed the MXU operands in the weight dtype (bf16 -> single-pass
        # matmul); accumulate in f32.
        rhs = h.astype(w.dtype)
        h = jnp.dot(w, rhs, preferred_element_type=jnp.float32) + b
        if li < num_linear - 1:
            # LeakyReLU(0.3) in f32 (v5e VPU has no bf16 path).
            h = jnp.where(h >= 0.0, h, neg_slope * h)
    out_ref[...] = h.astype(out_ref.dtype)


def mlp_forward_fm(x_fm, params, *, max_tile_b=None):
    """Fused MLP forward on feature-major activations (hot path, no transposes).

    x_fm:   (in_dim, B), f32 or bf16 (batch on the last/lane axis).
    params: list of (W, b) with W (out_f, in_f) [PyTorch layout], b (out_f, 1).
    Returns (out_dim, B) in x_fm.dtype.
    """
    in_dim, B = x_fm.shape
    num_linear = len(params)
    out_dim = params[-1][0].shape[0]
    hidden_widths = [int(w.shape[0]) for w, _ in params[:-1]] or [out_dim]
    max_hidden = max(hidden_widths)
    itemsize = x_fm.dtype.itemsize

    # --- batch tile from VMEM budget -------------------------------------
    # per column: double-buffered x + out tiles (storage dtype) + f32 hidden.
    per_col = 2 * (in_dim + out_dim) * itemsize + 4 * max_hidden
    tb = (_ACT_VMEM_BUDGET // per_col) // _LANE * _LANE
    tb = max(_LANE, min(tb, _MAX_TILE_B))
    if max_tile_b is not None:
        tb = max(_LANE, min(tb, _round_up(int(max_tile_b), _LANE)))
    b128 = _round_up(B, _LANE)
    tb = min(tb, b128)
    # Give both v7x TensorCores work once the batch is big enough to amortize
    # the per-step pipeline overhead (harmless elsewhere).
    if _cdiv(B, tb) < 2 and b128 >= 2 * _MIN_COLS_PER_CORE:
        tb = _round_up(_cdiv(b128, 2), _LANE)
    grid_n = _cdiv(B, tb)

    # --- specs -------------------------------------------------------------
    # Deeper buffering only helps in the small-tile regime; keep default
    # double buffering for large tiles / ragged edges.
    use_deep = (grid_n >= 3) and (tb < 32768) and (B % tb == 0) and hasattr(pl, "Buffered")

    def act_spec(shape, imap):
        if use_deep:
            try:
                return pl.BlockSpec(shape, imap, pipeline_mode=pl.Buffered(3))
            except TypeError:
                pass
        return pl.BlockSpec(shape, imap)

    flat_args = [x_fm]
    in_specs = [act_spec((in_dim, tb), lambda i: (0, i))]
    weight_bytes = 0
    for w, b in params:
        flat_args.append(w)
        flat_args.append(b)
        # Constant index_map -> weights/biases stay VMEM-resident.
        in_specs.append(pl.BlockSpec(w.shape, lambda i: (0, 0)))
        in_specs.append(pl.BlockSpec(b.shape, lambda i: (0, 0)))
        weight_bytes += w.size * w.dtype.itemsize + b.size * b.dtype.itemsize
    out_spec = act_spec((out_dim, tb), lambda i: (0, i))

    # --- cost hint + VMEM limit --------------------------------------------
    flops = 2 * B * sum(int(w.shape[0]) * int(w.shape[1]) for w, _ in params)
    bytes_accessed = (in_dim + out_dim) * B * itemsize + weight_bytes
    cost = pl.CostEstimate(flops=flops, transcendentals=0,
                           bytes_accessed=bytes_accessed)

    vmem_need = per_col * tb + 2 * weight_bytes + (2 << 20)  # + 2 MiB slack
    vmem_limit = int(min(_VMEM_LIMIT_CAP, max(vmem_need, 16 << 20)))

    kernel = functools.partial(_mlp_kernel, num_linear, NEG_SLOPE)

    return pl.pallas_call(
        kernel,
        out_shape=jax.ShapeDtypeStruct((out_dim, B), x_fm.dtype),
        grid=(grid_n,),
        in_specs=in_specs,
        out_specs=out_spec,
        compiler_params=pltpu.CompilerParams(
            dimension_semantics=("parallel",),  # shard tiles across v7x's 2 TCs
            vmem_limit_bytes=vmem_limit,
        ),
        cost_estimate=cost,
    )(*flat_args)


def mlp_forward(x, params, *, max_tile_b=None):
    """Batch-major convenience wrapper: x (B, in_dim) -> (B, out_dim).

    For hot paths, call `mlp_forward_fm` with feature-major activations to
    avoid the two transposes entirely.
    """
    return mlp_forward_fm(x.T, params, max_tile_b=max_tile_b).T


def init_mlp_params(key, input_dim=6, output_dim=6, num_neurons=20, num_layers=1,
                    dtype=jnp.float32):
    """Deterministic init mimicking torch.nn.Linear default
    (U[-1/sqrt(fan_in), 1/sqrt(fan_in)]). Weights in PyTorch (out, in) layout."""
    dims = [(input_dim, num_neurons)]
    for _ in range(num_layers - 1):
        dims.append((num_neurons, num_neurons))
    dims.append((num_neurons, output_dim))

    params = []
    for fan_in, fan_out in dims:
        key, kw, kb = jax.random.split(key, 3)
        bound = 1.0 / (float(fan_in) ** 0.5)
        w = jax.random.uniform(kw, (fan_out, fan_in), jnp.float32, -bound, bound)
        b = jax.random.uniform(kb, (fan_out, 1), jnp.float32, -bound, bound)
        params.append((w.astype(dtype), b.astype(dtype)))
    return params


def mlp_reference(x, params, neg_slope=NEG_SLOPE):
    """Pure-JAX reference (f32 math), same semantics as the PyTorch module."""
    h = x.astype(jnp.float32)
    n = len(params)
    for i, (w, b) in enumerate(params):
        h = h @ w.astype(jnp.float32).T + b.astype(jnp.float32).reshape(1, -1)
        if i < n - 1:
            h = jnp.where(h >= 0.0, h, neg_slope * h)
    return h


# TODO(synk): training_step / losses / data loading / min-max scaling from the
# PyTorch module are host-side utilities and are not translated to Pallas.

if __name__ == "__main__":
    key = jax.random.PRNGKey(0)
    k_x, k_p, k_x2, k_x3, k_x4 = jax.random.split(key, 5)

    input_dim, output_dim, num_neurons, num_layers = 6, 6, 20, 1
    params = init_mlp_params(k_p, input_dim, output_dim, num_neurons, num_layers)

    # 1) Small-batch f32, single tile.
    x = jax.random.normal(k_x, (8, input_dim), jnp.float32)
    out = jax.block_until_ready(mlp_forward(x, params))
    ref = mlp_reference(x, params)
    assert out.shape == (8, output_dim)
    assert jnp.allclose(out, ref, atol=1e-5, rtol=1e-5), "f32 mismatch vs reference"

    # 2) Multi-tile with a ragged last block (Pallas edge-block padding path).
    x2 = jax.random.normal(k_x2, (300, input_dim), jnp.float32)
    out2 = jax.block_until_ready(mlp_forward(x2, params, max_tile_b=128))
    ref2 = mlp_reference(x2, params)
    assert out2.shape == (300, output_dim)
    assert jnp.allclose(out2, ref2, atol=1e-4, rtol=1e-4), "ragged multi-tile mismatch"

    # 3) Small-tile regime with evenly dividing tiles (exercises Buffered(3)).
    x3 = jax.random.normal(k_x4, (512, input_dim), jnp.float32)
    out3 = jax.block_until_ready(mlp_forward(x3, params, max_tile_b=128))
    ref3 = mlp_reference(x3, params)
    assert jnp.allclose(out3, ref3, atol=1e-4, rtol=1e-4), "deep-buffer mismatch"

    # 4) Hot path: feature-major bf16 storage, bf16 MXU operands, f32 accum.
    xb = jax.random.normal(k_x3, (2048, input_dim), jnp.float32).astype(jnp.bfloat16)
    params_bf = [(w.astype(jnp.bfloat16), b.astype(jnp.bfloat16)) for w, b in params]
    out_fm = jax.block_until_ready(mlp_forward_fm(xb.T, params_bf))
    ref_bf = mlp_reference(xb, params_bf)
    assert out_fm.shape == (output_dim, 2048)
    assert jnp.allclose(out_fm.T.astype(jnp.float32), ref_bf, atol=2e-2, rtol=2e-2), \
        "bf16 mismatch vs reference"

    print("KERNEL_OK")
</pallas_src>

<mosaic_0001>
module attributes {stable_mosaic.version = 11 : i64} {
  func.func @_mlp_kernel(%arg0: i32, %arg1: memref<6x128xf32, #tpu.memory_space<vmem>>, %arg2: memref<20x6xf32, #tpu.memory_space<vmem>>, %arg3: memref<20x1xf32, #tpu.memory_space<vmem>>, %arg4: memref<6x20xf32, #tpu.memory_space<vmem>>, %arg5: memref<6x1xf32, #tpu.memory_space<vmem>>, %arg6: memref<6x128xf32, #tpu.memory_space<vmem>>) attributes {dimension_semantics = [#tpu.dimension_semantics<parallel>], iteration_bounds = array<i64: 1>, scalar_prefetch = 0 : i64, scratch_operands = 0 : i64, tpu.core_type = #tpu.core_type<tc>, window_params = [{transform_indices = @transform_0, window_bounds = array<i64: 6, 128>}, {pipeline_mode = #tpu.pipeline_mode<synchronous>, transform_indices = @transform_1, window_bounds = array<i64: 20, 6>}, {pipeline_mode = #tpu.pipeline_mode<synchronous>, transform_indices = @transform_2, window_bounds = array<i64: 20, 1>}, {pipeline_mode = #tpu.pipeline_mode<synchronous>, transform_indices = @transform_3, window_bounds = array<i64: 6, 20>}, {pipeline_mode = #tpu.pipeline_mode<synchronous>, transform_indices = @transform_4, window_bounds = array<i64: 6, 1>}, {transform_indices = @transform_5, window_bounds = array<i64: 6, 128>}]} {
    %c0 = arith.constant 0 : index
    %c0_0 = arith.constant 0 : index
    %0 = vector.load %arg1[%c0, %c0_0] : memref<6x128xf32, #tpu.memory_space<vmem>>, vector<6x128xf32>
    %c0_1 = arith.constant 0 : index
    %c0_2 = arith.constant 0 : index
    %1 = vector.load %arg2[%c0_1, %c0_2] : memref<20x6xf32, #tpu.memory_space<vmem>>, vector<20x6xf32>
    %c0_3 = arith.constant 0 : index
    %c0_4 = arith.constant 0 : index
    %2 = vector.load %arg3[%c0_3, %c0_4] : memref<20x1xf32, #tpu.memory_space<vmem>>, vector<20x1xf32>
    %cst = arith.constant dense<0.000000e+00> : vector<20x128xf32>
    %3 = tpu.matmul %1, %0, %cst {dimension_numbers = #tpu.dot_dimension_numbers<[1], [0], [0], [1], [0, 0, 1, 1], [], []>} : vector<20x6xf32>, vector<6x128xf32>, vector<20x128xf32> -> vector<20x128xf32>
    %4 = vector.broadcast %2 : vector<20x1xf32> to vector<20x128xf32>
    %5 = arith.addf %3, %4 : vector<20x128xf32>
    %cst_5 = arith.constant 0.000000e+00 : f32
    %6 = vector.broadcast %cst_5 : f32 to vector<20x128xf32>
    %7 = arith.cmpf oge, %5, %6 : vector<20x128xf32>
    %cst_6 = arith.constant 3.000000e-01 : f32
    %8 = vector.broadcast %cst_6 : f32 to vector<20x128xf32>
    %9 = arith.mulf %8, %5 : vector<20x128xf32>
    %10 = arith.select %7, %5, %9 : vector<20x128xi1>, vector<20x128xf32>
    %c0_7 = arith.constant 0 : index
    %c0_8 = arith.constant 0 : index
    %11 = vector.load %arg4[%c0_7, %c0_8] : memref<6x20xf32, #tpu.memory_space<vmem>>, vector<6x20xf32>
    %c0_9 = arith.constant 0 : index
    %c0_10 = arith.constant 0 : index
    %12 = vector.load %arg5[%c0_9, %c0_10] : memref<6x1xf32, #tpu.memory_space<vmem>>, vector<6x1xf32>
    %cst_11 = arith.constant dense<0.000000e+00> : vector<6x128xf32>
    %13 = tpu.matmul %11, %10, %cst_11 {dimension_numbers = #tpu.dot_dimension_numbers<[1], [0], [0], [1], [0, 0, 1, 1], [], []>} : vector<6x20xf32>, vector<20x128xf32>, vector<6x128xf32> -> vector<6x128xf32>
    %14 = vector.broadcast %12 : vector<6x1xf32> to vector<6x128xf32>
    %15 = arith.addf %13, %14 : vector<6x128xf32>
    %c0_12 = arith.constant 0 : index
    %c0_13 = arith.constant 0 : index
    %16 = vector.load %arg6[%c0_12, %c0_13] : memref<6x128xf32, #tpu.memory_space<vmem>>, vector<6x128xf32>
    tpu.vector_store %arg6[%c0_12, %c0_13], %15 {strides = array<i32>} : memref<6x128xf32, #tpu.memory_space<vmem>>, vector<6x128xf32>,
    return
  }
  func.func @transform_0(%arg0: i32) -> (i32, i32) {
    %c0_i32 = arith.constant 0 : i32
    %c0_i32_0 = arith.constant 0 : i32
    return %c0_i32, %arg0 : i32, i32
  }
  func.func @transform_1(%arg0: i32) -> (i32, i32) {
    %c0_i32 = arith.constant 0 : i32
    %c0_i32_0 = arith.constant 0 : i32
    %c0_i32_1 = arith.constant 0 : i32
    return %c0_i32, %c0_i32_0 : i32, i32
  }
  func.func @transform_2(%arg0: i32) -> (i32, i32) {
    %c0_i32 = arith.constant 0 : i32
    %c0_i32_0 = arith.constant 0 : i32
    %c0_i32_1 = arith.constant 0 : i32
    return %c0_i32, %c0_i32_0 : i32, i32
  }
  func.func @transform_3(%arg0: i32) -> (i32, i32) {
    %c0_i32 = arith.constant 0 : i32
    %c0_i32_0 = arith.constant 0 : i32
    %c0_i32_1 = arith.constant 0 : i32
    return %c0_i32, %c0_i32_0 : i32, i32
  }
  func.func @transform_4(%arg0: i32) -> (i32, i32) {
    %c0_i32 = arith.constant 0 : i32
    %c0_i32_0 = arith.constant 0 : i32
    %c0_i32_1 = arith.constant 0 : i32
    return %c0_i32, %c0_i32_0 : i32, i32
  }
  func.func @transform_5(%arg0: i32) -> (i32, i32) {
    %c0_i32 = arith.constant 0 : i32
    %c0_i32_0 = arith.constant 0 : i32
    return %c0_i32, %arg0 : i32, i32
  }
}

</mosaic_0001>

<bundles_post_ra>
// kernel: tpu_custom_call.1
= control target key start
LH: loop header
LB: loop body
LE: loop exit
PB: predicated region body
PF: predicated region fallthrough
CT: control target
= control target key end

     0   :  { %vm53_vm0 = vcmask 1045504   ;;  %v308_v2 = vmov 0.0   ;;  %vm309_vm1 = vmmov 0   ;;  %vm43_vm2 = vcmask 48128   ;;  %s379_s0 = inlined_call_operand.vmem [shape: f32[6,8], index: 0, kind: input, shape index: {}]   ;;  %s380_s1 = inlined_call_operand.vmem [shape: f32[20,6], index: 1, kind: input, shape index: {}]   ;;  %s381_s2 = inlined_call_operand.vmem [shape: f32[20,1], index: 2, kind: input, shape index: {}]   ;;  %s382_s3 = inlined_call_operand.vmem [shape: f32[6,20], index: 3, kind: input, shape index: {}]   ;;  %s383_s4 = inlined_call_operand.vmem [shape: f32[6,1], index: 4, kind: input, shape index: {}]   ;;  %s384_s5 = inlined_call_operand.hbm [shape: f32[6,8], index: 5, kind: output, shape index: {}]  }
   0x1   :  { %v21_v0 = vld [vmem:[%s379_s0] sm:$0x3f]  ;;  %260 = vmatprep.subr.mxu0 %v308_v2  ;;  %262 = vmatprep.mubr.msk.f32.mxu0 %vm309_vm1, %v308_v2  ;;  %v310_v3 = vmov 0   ;;  %v27_v4 = vld [vmem:[%s381_s2 + $0x10] sm:$0xf] }
   0x2   :  { %v22_v1 = vld [vmem:[%s380_s1] sm:$0xff]  ;;  %261 = vmatpush3.msk.msra.mxu0 %vm53_vm0, %v21_v0  ;;  %285 = vset.pattern.permute.xlu1 %v310_v3 }
   0x3   :  { %v25_v5 = vld [vmem:[%s381_s2] sm:$0xff]  ;;  %263 = vmatmul.mubr.msk.f32.vlgmr.msra.gmra.mxu0 %vm43_vm2, %v22_v1  ;;  %284 = vset.pattern.permute.xlu0 %v310_v3 }
   0x4   :  { %10 = vsyncpa [#allocation3], 0  ;;  %265 = vmatprep.mubr.msk.f32.mxu0 %vm309_vm1, %v308_v2  ;;  %v23_v6 = vld [vmem:[%s380_s1 + $0x8] sm:$0xff]  ;;  %40 = vperm.xlu0 %284, %v27_v4   ;;  %v147_v8 = vld [vmem:[%s383_s4] sm:$0x3f]  ;;  %vm157_vm4 = vcmask 1043456  }
   0x5   :  { %30 = vperm.xlu1 %285, %v25_v5   ;;  %v26_v7 = vld [vmem:[%s381_s2 + $0x8] sm:$0xff]  ;;  %271 = vmatprep.subr.mxu1 %v308_v2  ;;  %v24_v9 = vld [vmem:[%s380_s1 + $0x10] sm:$0xf]  ;;  %v146_v27 = vld [vmem:[%s382_s3] sm:$0x3f]  ;;  %vm153_vm7 = vcmask 162816  }
   0x6   :  { %277 = vmatprep.mubr.msk.f32.mxu1 %vm309_vm1, %v308_v2  ;;  %s311_s4 = smov [#allocation2]  }
   0x7   :  { %266 = vmatmul.mubr.msk.f32.gmra.mxu0 %vm43_vm2, %v23_v6  ;;  %s238_s8 = sshll.u32 %s311_s4, 4  ;;  %s239_s8 = int_to_ptr.vmem [resolvable:$true] %s238_s8 }
   0x8   :  { %268 = vmatprep.mubr.msk.f32.mxu0 %vm309_vm1, %v308_v2  ;;  %35 = vperm.xlu0 %284, %v26_v7   ;;  %s286_s9 = scalar_lea.vmem %s239_s8, 128  ;;  %p291_p1 = scmp.lt.s32.totalorder %s239_s8, %s239_s8 }
   0x9   :  { %150 = vperm.xlu1 %285, %v147_v8   ;;  %p287_p0 = scmp.ne.s32.totalorder %s239_s8, %s286_s9  ;;  %p292_p2 = scmp.lt.s32.totalorder %s286_s9, %s286_s9 }
   0xb   :  { %269 = vmatmul.mubr.msk.f32.gmra.mxu0 %vm43_vm2, %v24_v9  ;;  %p293_p3 = por %p292_p2, %p291_p1 }
   0xd   :  { %p294_p4 = pnand %p293_p3, %p287_p0 }
  0x7f   :  { %v41_v10 = vpop.permute.xlu0 %40 }
  0x80   :  { %v31_v15 = vpop.permute.xlu1 %30 }
  0x83   :  { %v36_v13 = vpop.permute.xlu0 %35 }
  0x84   :  { %v151_v29 = vpop.permute.xlu1 %150 }
  0xc3   :  { %v123_v11 = vpop.f32.mrf.mxu0 }
  0xc4   :  { %v124_v19 = vadd.f32 %v123_v11, %v31_v15 }
  0xc5   :  { %v264_v12 = vpop.f32.mrf.mxu0 }
  0xc6   :  { %v140_v24 = vmul.f32 0.3, %v124_v19  ;;  %vm137_vm6 = vcmp.ge.f32.partialorder %v124_v19, 0.0 }
  0xc7   :  { %v128_v14 = vpop.f32.mrf.mxu0 }
  0xc8   :  { %v129_v17 = vadd.f32 %v128_v14, %v36_v13  ;;  %v143_v28 = vsel %vm137_vm6, %v124_v19, %v140_v24 }
  0xc9   :  { %v267_v16 = vpop.f32.mrf.mxu0 }
  0xca   :  { %v141_v22 = vmul.f32 0.3, %v129_v17  ;;  %vm138_vm5 = vcmp.ge.f32.partialorder %v129_v17, 0.0 }
  0xcb   :  { %v133_v18 = vpop.f32.mrf.mxu0 }
  0xcc   :  { %v134_v20 = vadd.f32 %v133_v18, %v41_v10  ;;  %v144_v26 = vsel %vm138_vm5, %v129_v17, %v141_v22 }
  0xcd   :  { %v270_v21 = vpop.f32.mrf.mxu0 }
  0xce   :  { %v142_v23 = vmul.f32 0.3, %v134_v20  ;;  %vm139_vm3 = vcmp.ge.f32.partialorder %v134_v20, 0.0 }
  0xd0   :  { %v145_v25 = vsel %vm139_vm3, %v134_v20, %v142_v23 }
  0xd1   :  { %272 = vmatpush3.msk.msra.mxu1 %vm157_vm4, %v145_v25 }
  0xd2   :  { %273 = vmatprep.subr.mxu1 %v308_v2 }
  0xd3   :  { %274 = vmatpush3.msra.mxu1 %v144_v26 }
  0xd4   :  { %275 = vmatprep.subr.mxu1 %v308_v2 }
  0xd5   :  { %276 = vmatpush3.msra.mxu1 %v143_v28 }
  0xd6   :  { %278 = vmatmul.mubr.msk.f32.vlgmr.msra.gmra.mxu1 %vm153_vm7, %v146_v27 }
 0x196   :  { %v227_v30 = vpop.f32.mrf.mxu1 }
 0x197   :  { %v228_v31 = vadd.f32 %v227_v30, %v151_v29 }
 0x198   :  { %v279_v32 = vpop.f32.mrf.mxu1 }
 0x199   :  { %231 = vst [vmem:[#allocation2] sm:$0x3f] %v228_v31 }
 0x19a   :  { %297 = shalt.err (!%p294_p4)
}
 0x19b   :  { %241 = dma.vmem_to_hbm [thread:$0]  %s239_s8, 128, %s384_s5, [#allocation3]  }
 0x19c   :  { %306 = dma.done.wait [#allocation3], 128  }
 0x19d   :  { %307 = vsyncadd [#allocation3], 4294967168 }
 0x19e   :  { %245 = vsyncpa [#allocation3], 1 }

</bundles_post_ra>
